<compile_context>
chip_gen: v6e
topology: v6e:2x2x1
jax: 0.10.0
libtpu: 0.0.40
codegen_flags: <defaults>
</compile_context>

<pallas_src>
import functools

import jax
import jax.numpy as jnp
from jax.experimental import pallas as pl
from jax.experimental.pallas import tpu as pltpu


def _round_up(n, m):
    return ((n + m - 1) // m) * m


def _choose_tile(batch, requested):
    """Pick a batch tile and grid size.

    Returns (tile_b, n_tiles).  tile_b is either a multiple of 8 (f32 sublane
    alignment) or exactly `batch` (block dim == full array dim, always legal).
    """
    requested = max(8, (requested // 8) * 8)          # sublane-aligned request
    if batch > requested:
        return requested, pl.cdiv(batch, requested)   # streaming multi-tile
    if batch >= 256:
        # Whole batch would fit in one tile: split in two so a dual-TC chip
        # (v7x) can shard the "parallel" grid axis across both cores.
        tile = _round_up(pl.cdiv(batch, 2), 8)
        return tile, pl.cdiv(batch, tile)
    return batch, 1                                   # single full-batch block


def _autoencoder_kernel(x_ref, we_ref, be_ref, wd_ref, bd_ref, o_ref):
    """Fused encoder -> ReLU -> decoder on one (tile_b, in_features) block.

    x_ref : (tile_b, in_features)   f32
    we_ref: (in_features, latent)   f32
    be_ref: (1, latent)             f32
    wd_ref: (latent, out_features)  f32
    bd_ref: (1, out_features)       f32
    o_ref : (tile_b, out_features)  f32
    """
    # encoder: h = x @ W_enc + b_enc, ReLU  (f32 MXU accumulation)
    h = jnp.dot(x_ref[...], we_ref[...], preferred_element_type=jnp.float32)
    h = jnp.maximum(h + be_ref[...], 0.0)
    # decoder: y = h @ W_dec + b_dec
    y = jnp.dot(h, wd_ref[...], preferred_element_type=jnp.float32)
    o_ref[...] = (y + bd_ref[...]).astype(o_ref.dtype)


@functools.partial(jax.jit, static_argnames=("tile_b",))
def final_model_forward(x, w_enc, b_enc, w_dec, b_dec, *, tile_b=4096):
    """FinalModel.forward: decoder(encoder(x)), fused in one Pallas kernel."""
    batch, in_features = x.shape
    latent = w_enc.shape[1]
    out_features = w_dec.shape[1]

    x = x.astype(jnp.float32)
    w_enc = w_enc.astype(jnp.float32)
    w_dec = w_dec.astype(jnp.float32)
    b_enc2 = jnp.reshape(b_enc, (1, latent)).astype(jnp.float32)
    b_dec2 = jnp.reshape(b_dec, (1, out_features)).astype(jnp.float32)

    tile, n_tiles = _choose_tile(batch, tile_b)

    # ---- cost / VMEM budgeting (from the real working set) ------------------
    const_bytes = (in_features * latent + latent * out_features
                   + latent + out_features) * 4
    tile_bytes = tile * (in_features + out_features) * 4
    vmem_limit = min(max(2 * (2 * tile_bytes + const_bytes), 4 << 20), 32 << 20)

    flops = 2 * batch * (in_features * latent + latent * out_features)
    bytes_accessed = batch * (in_features + out_features) * 4 + const_bytes
    cost = pl.CostEstimate(flops=flops, transcendentals=0,
                           bytes_accessed=bytes_accessed)

    # ---- pallas_call --------------------------------------------------------
    y = pl.pallas_call(
        _autoencoder_kernel,
        out_shape=jax.ShapeDtypeStruct((batch, out_features), jnp.float32),
        grid=(n_tiles,),
        in_specs=[
            pl.BlockSpec((tile, in_features), lambda i: (i, 0)),     # x tile
            pl.BlockSpec((in_features, latent), lambda i: (0, 0)),   # W_enc
            pl.BlockSpec((1, latent), lambda i: (0, 0)),             # b_enc
            pl.BlockSpec((latent, out_features), lambda i: (0, 0)),  # W_dec
            pl.BlockSpec((1, out_features), lambda i: (0, 0)),       # b_dec
        ],
        out_specs=pl.BlockSpec((tile, out_features), lambda i: (i, 0)),
        compiler_params=pltpu.CompilerParams(
            dimension_semantics=("parallel",),
            vmem_limit_bytes=int(vmem_limit)),
        cost_estimate=cost,
    )(x, w_enc, b_enc2, w_dec, b_dec2)

    return y.astype(x.dtype)


def _reference(x, w_enc, b_enc, w_dec, b_dec):
    """Plain-JAX f32 reference (matches the PyTorch module)."""
    h = jnp.dot(x, w_enc, preferred_element_type=jnp.float32) + b_enc.reshape(1, -1)
    h = jnp.maximum(h, 0.0)
    return jnp.dot(h, w_dec, preferred_element_type=jnp.float32) + b_dec.reshape(1, -1)


if __name__ == "__main__":
    in_features, latent = 32, 16

    key = jax.random.PRNGKey(0)
    k_x, k_we, k_be, k_wd, k_bd, k_x2 = jax.random.split(key, 6)

    w_enc = jax.random.normal(k_we, (in_features, latent), dtype=jnp.float32) * 0.1
    b_enc = jax.random.normal(k_be, (latent,), dtype=jnp.float32) * 0.1
    w_dec = jax.random.normal(k_wd, (latent, in_features), dtype=jnp.float32) * 0.1
    b_dec = jax.random.normal(k_bd, (in_features,), dtype=jnp.float32) * 0.1

    # Small batch (single block == full array dims).
    batch = 8
    x = jax.random.normal(k_x, (batch, in_features), dtype=jnp.float32)
    out = jax.block_until_ready(final_model_forward(x, w_enc, b_enc, w_dec, b_dec))
    ref = _reference(x, w_enc, b_enc, w_dec, b_dec)
    assert out.shape == (batch, in_features)
    assert jnp.allclose(out, ref, atol=1e-2, rtol=1e-2)

    # Larger, non-power-of-two batch: exercises the multi-tile grid and a
    # partially out-of-bounds last block (no wrapper-side padding).
    batch2 = 1000
    x2 = jax.random.normal(k_x2, (batch2, in_features), dtype=jnp.float32)
    out2 = jax.block_until_ready(
        final_model_forward(x2, w_enc, b_enc, w_dec, b_dec, tile_b=4096))
    ref2 = _reference(x2, w_enc, b_enc, w_dec, b_dec)
    assert out2.shape == (batch2, in_features)
    assert jnp.allclose(out2, ref2, atol=1e-2, rtol=1e-2)

    print("KERNEL_OK")
</pallas_src>

<mosaic_0001>
module attributes {stable_mosaic.version = 11 : i64} {
  func.func @_autoencoder_kernel(%arg0: i32, %arg1: memref<8x32xf32, #tpu.memory_space<vmem>>, %arg2: memref<32x16xf32, #tpu.memory_space<vmem>>, %arg3: memref<1x16xf32, #tpu.memory_space<vmem>>, %arg4: memref<16x32xf32, #tpu.memory_space<vmem>>, %arg5: memref<1x32xf32, #tpu.memory_space<vmem>>, %arg6: memref<8x32xf32, #tpu.memory_space<vmem>>) attributes {dimension_semantics = [#tpu.dimension_semantics<parallel>], iteration_bounds = array<i64: 1>, scalar_prefetch = 0 : i64, scratch_operands = 0 : i64, tpu.core_type = #tpu.core_type<tc>, window_params = [{transform_indices = @transform_0, window_bounds = array<i64: 8, 32>}, {pipeline_mode = #tpu.pipeline_mode<synchronous>, transform_indices = @transform_1, window_bounds = array<i64: 32, 16>}, {pipeline_mode = #tpu.pipeline_mode<synchronous>, transform_indices = @transform_2, window_bounds = array<i64: 1, 16>}, {pipeline_mode = #tpu.pipeline_mode<synchronous>, transform_indices = @transform_3, window_bounds = array<i64: 16, 32>}, {pipeline_mode = #tpu.pipeline_mode<synchronous>, transform_indices = @transform_4, window_bounds = array<i64: 1, 32>}, {transform_indices = @transform_5, window_bounds = array<i64: 8, 32>}]} {
    %c0 = arith.constant 0 : index
    %c0_0 = arith.constant 0 : index
    %0 = vector.load %arg1[%c0, %c0_0] : memref<8x32xf32, #tpu.memory_space<vmem>>, vector<8x32xf32>
    %c0_1 = arith.constant 0 : index
    %c0_2 = arith.constant 0 : index
    %1 = vector.load %arg2[%c0_1, %c0_2] : memref<32x16xf32, #tpu.memory_space<vmem>>, vector<32x16xf32>
    %cst = arith.constant dense<0.000000e+00> : vector<8x16xf32>
    %2 = tpu.matmul %0, %1, %cst {dimension_numbers = #tpu.dot_dimension_numbers<[1], [0], [0], [1], [0, 0, 1, 1], [], []>} : vector<8x32xf32>, vector<32x16xf32>, vector<8x16xf32> -> vector<8x16xf32>
    %c0_3 = arith.constant 0 : index
    %c0_4 = arith.constant 0 : index
    %3 = vector.load %arg3[%c0_3, %c0_4] : memref<1x16xf32, #tpu.memory_space<vmem>>, vector<1x16xf32>
    %4 = vector.broadcast %3 : vector<1x16xf32> to vector<8x16xf32>
    %5 = arith.addf %2, %4 : vector<8x16xf32>
    %cst_5 = arith.constant 0.000000e+00 : f32
    %6 = vector.broadcast %cst_5 : f32 to vector<8x16xf32>
    %7 = arith.maximumf %5, %6 : vector<8x16xf32>
    %c0_6 = arith.constant 0 : index
    %c0_7 = arith.constant 0 : index
    %8 = vector.load %arg4[%c0_6, %c0_7] : memref<16x32xf32, #tpu.memory_space<vmem>>, vector<16x32xf32>
    %cst_8 = arith.constant dense<0.000000e+00> : vector<8x32xf32>
    %9 = tpu.matmul %7, %8, %cst_8 {dimension_numbers = #tpu.dot_dimension_numbers<[1], [0], [0], [1], [0, 0, 1, 1], [], []>} : vector<8x16xf32>, vector<16x32xf32>, vector<8x32xf32> -> vector<8x32xf32>
    %c0_9 = arith.constant 0 : index
    %c0_10 = arith.constant 0 : index
    %10 = vector.load %arg5[%c0_9, %c0_10] : memref<1x32xf32, #tpu.memory_space<vmem>>, vector<1x32xf32>
    %11 = vector.broadcast %10 : vector<1x32xf32> to vector<8x32xf32>
    %12 = arith.addf %9, %11 : vector<8x32xf32>
    %c0_11 = arith.constant 0 : index
    %c0_12 = arith.constant 0 : index
    %13 = vector.load %arg6[%c0_11, %c0_12] : memref<8x32xf32, #tpu.memory_space<vmem>>, vector<8x32xf32>
    tpu.vector_store %arg6[%c0_11, %c0_12], %12 {strides = array<i32>} : memref<8x32xf32, #tpu.memory_space<vmem>>, vector<8x32xf32>,
    return
  }
  func.func @transform_0(%arg0: i32) -> (i32, i32) {
    %c0_i32 = arith.constant 0 : i32
    %c0_i32_0 = arith.constant 0 : i32
    return %arg0, %c0_i32 : i32, i32
  }
  func.func @transform_1(%arg0: i32) -> (i32, i32) {
    %c0_i32 = arith.constant 0 : i32
    %c0_i32_0 = arith.constant 0 : i32
    %c0_i32_1 = arith.constant 0 : i32
    return %c0_i32, %c0_i32_0 : i32, i32
  }
  func.func @transform_2(%arg0: i32) -> (i32, i32) {
    %c0_i32 = arith.constant 0 : i32
    %c0_i32_0 = arith.constant 0 : i32
    %c0_i32_1 = arith.constant 0 : i32
    return %c0_i32, %c0_i32_0 : i32, i32
  }
  func.func @transform_3(%arg0: i32) -> (i32, i32) {
    %c0_i32 = arith.constant 0 : i32
    %c0_i32_0 = arith.constant 0 : i32
    %c0_i32_1 = arith.constant 0 : i32
    return %c0_i32, %c0_i32_0 : i32, i32
  }
  func.func @transform_4(%arg0: i32) -> (i32, i32) {
    %c0_i32 = arith.constant 0 : i32
    %c0_i32_0 = arith.constant 0 : i32
    %c0_i32_1 = arith.constant 0 : i32
    return %c0_i32, %c0_i32_0 : i32, i32
  }
  func.func @transform_5(%arg0: i32) -> (i32, i32) {
    %c0_i32 = arith.constant 0 : i32
    %c0_i32_0 = arith.constant 0 : i32
    return %arg0, %c0_i32 : i32, i32
  }
}

</mosaic_0001>

<bundles_post_ra>
// kernel: final_model_forward.1
= control target key start
LH: loop header
LB: loop body
LE: loop exit
PB: predicated region body
PF: predicated region fallthrough
CT: control target
= control target key end

     0   :  { %v261_v1 = vmov 0.0   ;;  %vm262_vm0 = vmmov 0   ;;  %s326_s0 = inlined_call_operand.vmem [shape: f32[8,32], index: 0, kind: input, shape index: {}]   ;;  %s327_s1 = inlined_call_operand.vmem [shape: f32[32,16], index: 1, kind: input, shape index: {}]   ;;  %s328_s2 = inlined_call_operand.vmem [shape: f32[1,16], index: 2, kind: input, shape index: {}]   ;;  %s329_s3 = inlined_call_operand.vmem [shape: f32[16,32], index: 3, kind: input, shape index: {}]   ;;  %s330_s4 = inlined_call_operand.vmem [shape: f32[1,32], index: 4, kind: input, shape index: {}]   ;;  %s331_s5 = inlined_call_operand.hbm [shape: f32[8,32], index: 5, kind: output, shape index: {}]  }
   0x1   :  { %v25_v0 = vld [vmem:[%s327_s1 + $0x18] sm:$0xff]  ;;  %218 = vmatprep.subr.mxu0 %v261_v1  ;;  %v24_v2 = vld [vmem:[%s327_s1 + $0x10] sm:$0xff]  ;;  %226 = vmatprep.mubr.msk.f32.mxu0 %vm262_vm0, %v261_v1 }
   0x2   :  { %219 = vmatpush3.msra.mxu0 %v25_v0  ;;  %229 = vmatprep.subr.mxu1 %v261_v1 }
   0x3   :  { %10 = vsyncpa [#allocation3], 0  ;;  %220 = vmatprep.subr.mxu0 %v261_v1  ;;  %v23_v3 = vld [vmem:[%s327_s1 + $0x8] sm:$0xff]  ;;  %233 = vmatprep.mubr.msk.f32.mxu1 %vm262_vm0, %v261_v1  ;;  %v22_v4 = vld [vmem:[%s327_s1] sm:$0xff]  ;;  %vm33_vm1 = vcmask 261120   ;;  %vm117_vm2 = vcmask 130048  }
   0x4   :  { %221 = vmatpush3.msra.mxu0 %v24_v2  ;;  %v21_v5 = vld [vmem:[%s326_s0] sm:$0xff]  ;;  %v109_v6 = vld [vmem:[%s329_s3 + $0x8] sm:$0xff]  ;;  %s263_s9 = smov [#allocation2]  }
   0x5   :  { %222 = vmatprep.subr.mxu0 %v261_v1  ;;  %230 = vmatpush3.msra.mxu1 %v109_v6  ;;  %v108_v7 = vld [vmem:[%s329_s3] sm:$0xff]  ;;  %s198_s10 = sshll.u32 %s263_s9, 4  ;;  %s199_s10 = int_to_ptr.vmem [resolvable:$true] %s198_s10 }
   0x6   :  { %223 = vmatpush3.msra.mxu0 %v23_v3  ;;  %231 = vmatprep.subr.mxu1 %v261_v1  ;;  %v206_v8 = vld [vmem:[%s328_s2] ss:$0 sm:$0xff]  ;;  %s239_s3 = scalar_lea.vmem %s199_s10, 128  ;;  %p244_p1 = scmp.lt.s32.totalorder %s199_s10, %s199_s10 }
   0x7   :  { %224 = vmatprep.subr.mxu0 %v261_v1  ;;  %232 = vmatpush3.msra.mxu1 %v108_v7  ;;  %v208_v13 = vld [vmem:[%s330_s4] ss:$0 sm:$0xff]  ;;  %p240_p0 = scmp.ne.s32.totalorder %s199_s10, %s239_s3  ;;  %p245_p2 = scmp.lt.s32.totalorder %s239_s3, %s239_s3 }
   0x8   :  { %225 = vmatpush3.msra.mxu0 %v22_v4 }
   0x9   :  { %227 = vmatmul.mubr.msk.f32.vlgmr.msra.gmra.mxu0 %vm33_vm1, %v21_v5  ;;  %p246_p3 = por %p245_p2, %p244_p1 }
   0xb   :  { %p247_p4 = pnand %p246_p3, %p240_p0 }
  0xc9   :  { %v103_v9 = vpop.f32.mrf.mxu0 }
  0xca   :  { %v104_v10 = vadd.f32 %v206_v8, %v103_v9 }
  0xcb   :  { %v228_v11 = vpop.f32.mrf.mxu0 }
  0xcc   :  { %v107_v12 = vmax.f32 %v104_v10, 0.0 }
  0xce   :  { %234 = vmatmul.mubr.msk.f32.vlgmr.msra.gmra.mxu1 %vm117_vm2, %v107_v12 }
 0x18e   :  { %v187_v14 = vpop.f32.mrf.mxu1 }
 0x18f   :  { %v188_v15 = vadd.f32 %v208_v13, %v187_v14 }
 0x190   :  { %v235_v16 = vpop.f32.mrf.mxu1 }
 0x191   :  { %191 = vst.msk [vmem:[#allocation2] sm:$0xff] %vm33_vm1, %v188_v15 }
 0x192   :  { %250 = shalt.err (!%p247_p4)
}
 0x193   :  { %201 = dma.vmem_to_hbm [thread:$0]  %s199_s10, 128, %s331_s5, [#allocation3]  }
 0x194   :  { %259 = dma.done.wait [#allocation3], 128  }
 0x195   :  { %260 = vsyncadd [#allocation3], 4294967168 }
 0x196   :  { %205 = vsyncpa [#allocation3], 1 }

</bundles_post_ra>
